<compile_context>
chip_gen: v6e
topology: v6e:2x2x1
jax: 0.10.0
libtpu: 0.0.40
codegen_flags: <defaults>
</compile_context>

<pallas_src>
import functools

import jax
import jax.numpy as jnp
from jax import lax
from jax.experimental import pallas as pl
from jax.experimental.pallas import tpu as pltpu


def _round_up(x, m):
    return (x + m - 1) // m * m


def _pick_tile(dim, unit, cap):
    """Pick a tile size (multiple of `unit`, <= cap) that minimizes padding of `dim`."""
    dim_r = _round_up(dim, unit)
    if dim_r <= cap:
        return dim_r
    best, best_pad = cap, _round_up(dim, cap) - dim
    for c in range(cap, unit - 1, -unit):
        pad = _round_up(dim, c) - dim
        if pad < best_pad:
            best, best_pad = c, pad
    return best


# ----------------------------------------------------------------------------------
# Pallas kernel: grouped matmul  out_g = L_g @ R_g  with optionally fused
#   - per-K-row scale/shift + ReLU on R (folded BN->ReLU prologue of BN_AC_CONV3D)
#   - per-M-row bias + relu/tanh epilogue (folded trailing BN + activation)
#   - residual add in the output layout (MF_UNIT skip connections)
# L, R are bf16 (MXU-native); accumulation is f32 (VMEM scratch only when K is tiled).
# ----------------------------------------------------------------------------------
def _mm_kernel(*refs, pre, act, has_res, multi_k):
    i = 0
    l_ref = refs[i]; i += 1
    r_ref = refs[i]; i += 1
    if pre:
        s_ref, t_ref = refs[i], refs[i + 1]; i += 2
    b_ref = refs[i]; i += 1
    res_ref = None
    if has_res:
        res_ref = refs[i]; i += 1
    o_ref = refs[i]; i += 1
    acc_ref = refs[i] if multi_k else None

    r = r_ref[...]
    if pre:
        r = jnp.maximum(r.astype(jnp.float32) * s_ref[...] + t_ref[...], 0.0)
        r = r.astype(jnp.bfloat16)
    part = jnp.dot(l_ref[...], r, preferred_element_type=jnp.float32)

    def _epilogue(acc):
        y = acc + b_ref[...]
        if act == "relu":
            y = jnp.maximum(y, 0.0)
        elif act == "tanh":
            y = jnp.tanh(y)
        if has_res:
            y = y + res_ref[...].astype(jnp.float32)
        o_ref[...] = y.astype(o_ref.dtype)

    if multi_k:
        k = pl.program_id(3)

        @pl.when(k == 0)
        def _():
            acc_ref[...] = jnp.zeros_like(acc_ref)

        acc_ref[...] += part

        @pl.when(k == pl.num_programs(3) - 1)
        def _():
            _epilogue(acc_ref[...])
    else:
        _epilogue(part)


@functools.partial(jax.jit, static_argnames=("act", "out_dtype"))
def matmul_t(L, R, bias, r_scale=None, r_shift=None, residual=None, *, act="none",
             out_dtype=jnp.bfloat16):
    """L: (G, M, K), R: (G, K, P), bias: (G, M) -> (G, M, P).

    Optionally applies relu(R * r_scale + r_shift) (per K row) before the matmul, and
    adds `residual` (G, M, P) after the activation.  Output channels (M) sit on sublanes,
    positions (P) on the 128-lane axis (lane-dense stores).
    """
    G, M, K = L.shape
    _, _, P = R.shape
    tm = _pick_tile(M, 16, 256)     # sublanes (bf16 packs 16 rows/vreg)
    tk = _pick_tile(K, 128, 512)
    tn = _pick_tile(P, 128, 512)    # lanes
    Mp, Kp, Pp = _round_up(M, tm), _round_up(K, tk), _round_up(P, tn)
    nk = Kp // tk
    multi_k = nk > 1

    Lp = jnp.pad(L.astype(jnp.bfloat16), ((0, 0), (0, Mp - M), (0, Kp - K)))
    Rp = jnp.pad(R.astype(jnp.bfloat16), ((0, 0), (0, Kp - K), (0, Pp - P)))
    bp = jnp.pad(bias.astype(jnp.float32), ((0, 0), (0, Mp - M)))[:, :, None]

    pre = r_scale is not None
    has_res = residual is not None

    args = [Lp, Rp]
    in_specs = [pl.BlockSpec((None, tm, tk), lambda g, i, j, k: (g, i, k)),
                pl.BlockSpec((None, tk, tn), lambda g, i, j, k: (g, k, j))]
    if pre:
        sp = jnp.pad(r_scale.astype(jnp.float32), ((0, 0), (0, Kp - K)))[:, :, None]
        tp = jnp.pad(r_shift.astype(jnp.float32), ((0, 0), (0, Kp - K)))[:, :, None]
        args += [sp, tp]
        in_specs += [pl.BlockSpec((None, tk, 1), lambda g, i, j, k: (g, k, 0))] * 2
    args.append(bp)
    in_specs.append(pl.BlockSpec((None, tm, 1), lambda g, i, j, k: (g, i, 0)))
    if has_res:
        resp = jnp.pad(residual, ((0, 0), (0, Mp - M), (0, Pp - P)))
        args.append(resp)
        in_specs.append(pl.BlockSpec((None, tm, tn), lambda g, i, j, k: (g, i, j)))

    grid = (G, Mp // tm, Pp // tn, nk)
    out = pl.pallas_call(
        functools.partial(_mm_kernel, pre=pre, act=act, has_res=has_res,
                          multi_k=multi_k),
        out_shape=jax.ShapeDtypeStruct((G, Mp, Pp), out_dtype),
        grid=grid,
        in_specs=in_specs,
        out_specs=pl.BlockSpec((None, tm, tn), lambda g, i, j, k: (g, i, j)),
        scratch_shapes=[pltpu.VMEM((tm, tn), jnp.float32)] if multi_k else [],
        compiler_params=pltpu.CompilerParams(
            dimension_semantics=("parallel", "parallel", "parallel", "arbitrary")),
    )(*args)
    return out[:, :M, :P]


# ----------------------------------------------------------------------------------
# Pallas kernel: tail BN + ReLU + global (spatial+temporal) average pooling, lane-dense.
# ----------------------------------------------------------------------------------
def _tail_kernel(x_ref, s_ref, t_ref, o_ref, *, inv_cnt):
    y = jnp.maximum(x_ref[...].astype(jnp.float32) * s_ref[...] + t_ref[...], 0.0)
    o_ref[...] = jnp.sum(y, axis=0, keepdims=True) * inv_cnt


@jax.jit
def tail_pool(h, scale, shift):
    """tail BN+ReLU followed by the global average -> (N, C) with C on the lane axis."""
    N, C, T, H, W = h.shape
    THW = T * H * W
    xt = jnp.transpose(h.reshape(N, C, THW), (0, 2, 1))       # (N, THW, C)
    out = pl.pallas_call(
        functools.partial(_tail_kernel, inv_cnt=1.0 / THW),
        out_shape=jax.ShapeDtypeStruct((N, 1, C), jnp.float32),
        grid=(N,),
        in_specs=[pl.BlockSpec((None, THW, C), lambda n: (n, 0, 0)),
                  pl.BlockSpec((1, C), lambda n: (0, 0)),
                  pl.BlockSpec((1, C), lambda n: (0, 0))],
        out_specs=pl.BlockSpec((None, 1, C), lambda n: (n, 0, 0)),
        compiler_params=pltpu.CompilerParams(dimension_semantics=("parallel",)),
    )(xt, scale.reshape(1, C), shift.reshape(1, C))
    return out.reshape(N, C)


# ----------------------------------------------------------------------------------
# Convolution = (reshape or im2col gather) + Pallas grouped matmul
# ----------------------------------------------------------------------------------
@functools.partial(jax.jit,
                   static_argnames=("stride", "padding", "groups", "act", "out_dtype"))
def conv3d(x, w, in_bn=None, out_bn=None, residual=None, *,
           stride=(1, 1, 1), padding=(0, 0, 0), groups=1, act="none",
           out_dtype=jnp.bfloat16):
    """3-D conv as a Pallas grouped matmul (output-channels-on-sublanes layout).

    in_bn    = (scale, shift): BatchNorm->ReLU applied to the INPUT (BN_AC_CONV3D).
    out_bn   = (scale, shift): BatchNorm folded into the weights/bias AFTER the conv.
    act      : activation applied after out_bn in the kernel epilogue.
    residual : NCDHW tensor (same shape as the conv output) added in the epilogue.
    """
    N, Cin, T, H, W = x.shape
    Cout, Cin_g, kt, kh, kw = w.shape
    G = groups
    st, sh, sw = stride
    pt, ph, pw = padding
    To = (T + 2 * pt - kt) // st + 1
    Ho = (H + 2 * ph - kh) // sh + 1
    Wo = (W + 2 * pw - kw) // sw + 1
    KT = kt * kh * kw
    Cg = Cin // G
    Coutg = Cout // G

    has_pad = bool(pt or ph or pw)
    r_scale = r_shift = None
    if in_bn is not None:
        s_in, t_in = in_bn
        if has_pad:
            # The zero border of the conv padding must stay zero after BN+ReLU, so the
            # prologue is applied here (XLA fuses it into the tap gather below).
            x = jnp.maximum(
                x.astype(jnp.float32) * s_in[None, :, None, None, None]
                + t_in[None, :, None, None, None], 0.0)
        else:
            # Fold BN->ReLU into the kernel as a per-K-row (channel-major, tap-minor)
            # scale/shift + ReLU on the R tile.
            r_scale = jnp.repeat(s_in, KT).reshape(G, Cg * KT)
            r_shift = jnp.repeat(t_in, KT).reshape(G, Cg * KT)
    x = x.astype(jnp.bfloat16)

    # R = (G, Cg*KT, N*To*Ho*Wo) with rows ordered (channel-in-group, tap).
    if KT == 1 and (st, sh, sw) == (1, 1, 1):
        # pointwise conv: no im2col, just a relayout.
        R = jnp.transpose(x, (1, 0, 2, 3, 4)).reshape(G, Cg, N * T * H * W)
    else:
        # TODO(synk): the tap gather for k>1 convs still materializes the im2col matrix in
        # HBM (in bf16); fully fusing it into the kernel needs manual shifted-window DMA.
        xp = jnp.pad(x, ((0, 0), (0, 0), (pt, pt), (ph, ph), (pw, pw)))
        taps = []
        for dt in range(kt):
            for dh in range(kh):
                for dw in range(kw):
                    taps.append(xp[:, :,
                                   dt:dt + (To - 1) * st + 1:st,
                                   dh:dh + (Ho - 1) * sh + 1:sh,
                                   dw:dw + (Wo - 1) * sw + 1:sw])
        pat = jnp.stack(taps, axis=2)                    # (N, Cin, KT, To, Ho, Wo)
        pat = jnp.transpose(pat, (1, 2, 0, 3, 4, 5))     # (Cin, KT, N, To, Ho, Wo)
        R = pat.reshape(G, Cg * KT, N * To * Ho * Wo)

    # L = (G, Coutg, Cg*KT); fold trailing BN scale into the weights.
    L = w.reshape(G, Coutg, Cg * KT).astype(jnp.float32)
    if out_bn is not None:
        s_out, t_out = out_bn
        L = L * s_out.reshape(G, Coutg)[:, :, None]
        bias = t_out.reshape(G, Coutg).astype(jnp.float32)
    else:
        bias = jnp.zeros((G, Coutg), jnp.float32)

    # Residual in the kernel's output layout: channels on sublanes, positions on lanes.
    res_l = None
    if residual is not None:
        res_l = jnp.transpose(residual.astype(jnp.bfloat16),
                              (1, 0, 2, 3, 4)).reshape(G, Coutg, N * To * Ho * Wo)

    O = matmul_t(L, R, bias, r_scale, r_shift, res_l, act=act, out_dtype=out_dtype)
    O = O.reshape(G, Coutg, N, To, Ho, Wo)
    O = jnp.transpose(O, (2, 0, 1, 3, 4, 5)).reshape(N, Cout, To, Ho, Wo)
    return O


# ----------------------------------------------------------------------------------
# MF_UNIT (reconstructed)  — BN_AC_CONV3D = BatchNorm -> ReLU -> Conv3d
# ----------------------------------------------------------------------------------
def bn_ac_conv3d(x, p, stride=(1, 1, 1), padding=(0, 0, 0), residual=None):
    return conv3d(x, p["w"], in_bn=(p["bn_s"], p["bn_t"]), residual=residual,
                  stride=stride, padding=padding, groups=p["g"])


def mf_unit(x, p):
    stride = p["stride"]
    h = bn_ac_conv3d(x, p["i1"])
    x_in = bn_ac_conv3d(h, p["i2"], residual=x)                 # x + conv_i2(h)
    h = bn_ac_conv3d(x_in, p["m1"], stride=stride, padding=(1, 1, 1))
    if p["first"]:
        h = bn_ac_conv3d(h, p["m2"])
        return bn_ac_conv3d(x, p["w1"], stride=stride, residual=h)   # h + conv_w1(x)
    return bn_ac_conv3d(h, p["m2"], padding=(0, 1, 1), residual=x)   # conv_m2(h) + x


# ----------------------------------------------------------------------------------
# Motion_Exctractor_Cen
# ----------------------------------------------------------------------------------
@jax.jit
def motion_extractor(h, p):
    N, C, F, H, W = h.shape
    S = h.shape[3]                        # reference uses h.shape[3]
    HW = H * W
    E = p["up_b"].shape[0]                # num_embedding = 20

    # centroid-index matrix composed with the mh_up Linear weight (both are linear maps)
    ii = jnp.arange(S, dtype=jnp.float32)
    I, J = jnp.meshgrid(ii, ii, indexing="ij")
    idx = jnp.stack([I, J], axis=-1).reshape(S * S, 2)        # (HW, 2)
    Mcomb = idx @ p["up_w"].T                                  # (HW, E)

    # temporal diff of mh_norm(h): the BN shift cancels, the per-channel scale stays.
    hf = h.astype(jnp.float32).reshape(N, C, F, HW)
    d = (hf[:, :, 1:] - hf[:, :, :-1]) * p["norm_scale"][None, :, None, None]
    R = jnp.transpose(d, (3, 0, 1, 2)).reshape(1, HW, N * C * (F - 1))
    L = jnp.transpose(Mcomb)[None]                             # (1, E, HW)
    out = matmul_t(L, R, p["up_b"][None, :], act="none",
                   out_dtype=jnp.bfloat16)                     # (1, E, N*C*(F-1))
    m = out[0].reshape(E, N, C, F - 1)
    m = jnp.transpose(m, (1, 2, 3, 0))                         # (N, C, F-1, E)

    # mh_conv1 / mh_conv2: Conv2d k=(1,3) s=(1,2) p=(0,1) as 3-D convs with a dummy depth;
    # BatchNorm is folded into the weights/bias and tanh runs in the kernel epilogue.
    m5 = m[:, :, None, :, :]                                   # (N, C, 1, F-1, E)
    c1 = conv3d(m5, p["c1_w"][:, :, None, :, :],
                out_bn=(p["c1_bn_s"], p["c1_bn_t"]),
                stride=(1, 1, 2), padding=(0, 0, 1), act="tanh")
    c2 = conv3d(c1, p["c2_w"][:, :, None, :, :],
                out_bn=(p["c2_bn_s"], p["c2_bn_t"]),
                stride=(1, 1, 2), padding=(0, 0, 1), act="tanh")
    c2 = c2[:, :, 0].astype(jnp.float32)                       # (N, 96, F-1, 5)
    motion_h = jnp.mean(c2, axis=3, keepdims=True)             # AvgPool2d((1,5), stride 1)
    return motion_h


def classifier(feat, w, b):
    out = matmul_t(w[None], jnp.transpose(feat)[None], b[None],
                   act="none", out_dtype=jnp.float32)          # (1, ncls, N)
    return jnp.transpose(out[0])


# ----------------------------------------------------------------------------------
# parameter initialization (deterministic, inference-mode BatchNorm)
# ----------------------------------------------------------------------------------
class _KeyGen:
    def __init__(self, seed):
        self._base = jax.random.PRNGKey(seed)
        self._i = 0

    def __call__(self):
        self._i += 1
        return jax.random.fold_in(self._base, self._i)


def _xavier(kg, shape, fan_in, fan_out):
    std = (2.0 / (fan_in + fan_out)) ** 0.5
    return std * jax.random.normal(kg(), shape, jnp.float32)


def _init_conv_w(kg, cout, cin_g, k):
    rec = k[0] * k[1] * k[2]
    return _xavier(kg, (cout, cin_g) + tuple(k), cin_g * rec, cout * rec)


def _init_bn(kg, c, eps=1e-5):
    gamma = 1.0 + 0.1 * jax.random.normal(kg(), (c,), jnp.float32)
    beta = 0.1 * jax.random.normal(kg(), (c,), jnp.float32)
    scale = gamma / jnp.sqrt(1.0 + eps)     # running_mean=0, running_var=1
    shift = beta
    return scale, shift


def _init_bn_ac_conv(kg, cin, cout, kernel, g=1):
    s, t = _init_bn(kg, cin)
    return {"bn_s": s, "bn_t": t, "w": _init_conv_w(kg, cout, cin // g, kernel), "g": g}


def _init_mf_unit(kg, num_in, num_mid, num_out, g, first_block, stride):
    num_ix = num_mid // 4
    p = {"first": first_block, "stride": stride,
         "i1": _init_bn_ac_conv(kg, num_in, num_ix, (1, 1, 1)),
         "i2": _init_bn_ac_conv(kg, num_ix, num_in, (1, 1, 1)),
         "m1": _init_bn_ac_conv(kg, num_in, num_mid, (3, 3, 3), g=g)}
    if first_block:
        p["m2"] = _init_bn_ac_conv(kg, num_mid, num_out, (1, 1, 1))
        p["w1"] = _init_bn_ac_conv(kg, num_in, num_out, (1, 1, 1))
    else:
        p["m2"] = _init_bn_ac_conv(kg, num_mid, num_out, (1, 3, 3), g=g)
    return p


def _init_motion(kg, inplanes, iterplanes, outplanes, num_embedding=20):
    ns, nt = _init_bn(kg, inplanes)
    up_w = _xavier(kg, (num_embedding, 2), 2, num_embedding)
    up_b = 0.1 * jax.random.normal(kg(), (num_embedding,), jnp.float32)
    c1_w = _xavier(kg, (iterplanes, inplanes, 1, 3), inplanes * 3, iterplanes * 3)
    c1_s, c1_t = _init_bn(kg, iterplanes)
    c2_w = _xavier(kg, (outplanes, iterplanes, 1, 3), iterplanes * 3, outplanes * 3)
    c2_s, c2_t = _init_bn(kg, outplanes)
    return dict(norm_scale=ns, norm_shift=nt, up_w=up_w, up_b=up_b,
                c1_w=c1_w, c1_bn_s=c1_s, c1_bn_t=c1_t,
                c2_w=c2_w, c2_bn_s=c2_s, c2_bn_t=c2_t)


def init_mfnet(num_classes, seed=0):
    kg = _KeyGen(seed)
    groups = 16
    k_sec = {2: 3, 3: 4, 4: 6, 5: 3}
    conv1_num_out = 16
    params = {}
    params["conv1_w"] = _init_conv_w(kg, conv1_num_out, 3, (3, 5, 5))
    params["conv1_bn_s"], params["conv1_bn_t"] = _init_bn(kg, conv1_num_out)

    def make_stage(num_in0, num_mid, num_out, n_blocks, first_stride):
        blocks = []
        for i in range(1, n_blocks + 1):
            first = (i == 1)
            num_in = num_in0 if first else num_out
            stride = first_stride if first else (1, 1, 1)
            blocks.append(_init_mf_unit(kg, num_in, num_mid, num_out, groups, first, stride))
        return blocks

    conv2_out, conv3_out, conv4_out, conv5_out = 96, 192, 384, 768
    params["conv2"] = make_stage(conv1_num_out, 96, conv2_out, k_sec[2], (2, 1, 1))
    params["conv3"] = make_stage(conv2_out, 192, conv3_out, k_sec[3], (1, 2, 2))
    params["conv4"] = make_stage(conv3_out, 384, conv4_out, k_sec[4], (1, 2, 2))
    params["conv5"] = make_stage(conv4_out, 768, conv5_out, k_sec[5], (1, 2, 2))

    params["motion"] = _init_motion(kg, inplanes=conv4_out, iterplanes=conv3_out,
                                    outplanes=conv2_out, num_embedding=20)
    params["tail_bn_s"], params["tail_bn_t"] = _init_bn(kg, conv5_out)
    feat_dim = conv5_out + conv2_out * 7
    params["cls_w"] = _xavier(kg, (num_classes, feat_dim), feat_dim, num_classes)
    params["cls_b"] = jnp.zeros((num_classes,), jnp.float32)
    return params


# ----------------------------------------------------------------------------------
# full forward pass
# ----------------------------------------------------------------------------------
def mfnet_forward(params, x):
    assert x.shape[2] == 16
    h = conv3d(x, params["conv1_w"],
               out_bn=(params["conv1_bn_s"], params["conv1_bn_t"]),
               stride=(1, 2, 2), padding=(1, 2, 2), act="relu")
    # TODO(synk): MaxPool3d kept as lax.reduce_window glue (small mem-bound op).
    h = lax.reduce_window(h, jnp.asarray(-jnp.inf, h.dtype), lax.max,
                          (1, 1, 1, 3, 3), (1, 1, 1, 2, 2),
                          ((0, 0), (0, 0), (0, 0), (1, 1), (1, 1)))
    for p in params["conv2"]:
        h = mf_unit(h, p)
    for p in params["conv3"]:
        h = mf_unit(h, p)
    for p in params["conv4"]:
        h = mf_unit(h, p)

    motion_h = motion_extractor(h, params["motion"])           # (N, 96, F-1, 1)
    motion = motion_h.reshape(motion_h.shape[0], -1)           # (N, 672)

    for p in params["conv5"]:
        h = mf_unit(h, p)

    pooled = tail_pool(h, params["tail_bn_s"], params["tail_bn_t"])   # (N, 768)
    feat = jnp.concatenate([pooled, motion], axis=1)                  # (N, 1440)
    logits = classifier(feat, params["cls_w"], params["cls_b"])
    return logits, motion_h


# ----------------------------------------------------------------------------------
# tiny numerical self-check of the Pallas matmul kernel (bf16 MXU, f32 accumulation)
# ----------------------------------------------------------------------------------
def _self_check():
    key = jax.random.PRNGKey(42)
    L = jax.random.normal(key, (2, 16, 96), jnp.float32)
    R = jax.random.normal(jax.random.fold_in(key, 1), (2, 96, 256), jnp.float32)
    bias = jax.random.normal(jax.random.fold_in(key, 2), (2, 16), jnp.float32)
    s = jax.random.normal(jax.random.fold_in(key, 3), (2, 96), jnp.float32)
    t = jax.random.normal(jax.random.fold_in(key, 4), (2, 96), jnp.float32)
    res = jax.random.normal(jax.random.fold_in(key, 5), (2, 16, 256), jnp.float32)
    Lb = L.astype(jnp.bfloat16).astype(jnp.float32)

    # single-K-tile path + fused BN->ReLU prologue + relu epilogue
    got = matmul_t(L, R, bias, s, t, act="relu", out_dtype=jnp.float32)
    Rb = jnp.maximum(R.astype(jnp.bfloat16).astype(jnp.float32) * s[:, :, None]
                     + t[:, :, None], 0.0).astype(jnp.bfloat16).astype(jnp.float32)
    ref = jnp.maximum(jnp.einsum("gmk,gkp->gmp", Lb, Rb) + bias[:, :, None], 0.0)
    assert bool(jnp.allclose(got, ref, rtol=2e-2, atol=2e-2)), \
        float(jnp.max(jnp.abs(got - ref)))

    # single-K-tile path + fused residual add
    got2 = matmul_t(L, R, bias, None, None, res, act="none", out_dtype=jnp.float32)
    Rb2 = R.astype(jnp.bfloat16).astype(jnp.float32)
    ref2 = jnp.einsum("gmk,gkp->gmp", Lb, Rb2) + bias[:, :, None] + res
    assert bool(jnp.allclose(got2, ref2, rtol=2e-2, atol=2e-2)), \
        float(jnp.max(jnp.abs(got2 - ref2)))

    # multi-K-tile (accumulator) path + residual
    L3 = jax.random.normal(jax.random.fold_in(key, 6), (1, 32, 1024), jnp.float32)
    R3 = jax.random.normal(jax.random.fold_in(key, 7), (1, 1024, 256), jnp.float32)
    b3 = jnp.zeros((1, 32), jnp.float32)
    r3 = jax.random.normal(jax.random.fold_in(key, 8), (1, 32, 256), jnp.float32)
    got3 = matmul_t(L3, R3, b3, None, None, r3, act="none", out_dtype=jnp.float32)
    ref3 = jnp.einsum("gmk,gkp->gmp",
                      L3.astype(jnp.bfloat16).astype(jnp.float32),
                      R3.astype(jnp.bfloat16).astype(jnp.float32)) + r3
    assert bool(jnp.allclose(got3, ref3, rtol=2e-2, atol=2e-1)), \
        float(jnp.max(jnp.abs(got3 - ref3)))


if __name__ == "__main__":
    _self_check()

    num_classes = 10
    params = init_mfnet(num_classes, seed=0)

    # 16 frames are required by the module's assert; spatial 32 keeps the demo fast.
    # The canonical size is 224, where the global mean used for the tail exactly matches
    # AvgPool3d((1,7,7)) + AvgPool1d(8) of the reference.
    x = jax.random.normal(jax.random.PRNGKey(0), (1, 3, 16, 32, 32), jnp.float32)

    logits, motion_h = mfnet_forward(params, x)
    logits, motion_h = jax.block_until_ready((logits, motion_h))

    assert logits.shape == (1, num_classes), logits.shape
    assert motion_h.shape == (1, 96, 7, 1), motion_h.shape
    print("KERNEL_OK")
</pallas_src>

<mosaic_0001>
module attributes {stable_mosaic.version = 11 : i64} {
  func.func @_mm_kernel(%arg0: i32, %arg1: i32, %arg2: i32, %arg3: i32, %arg4: memref<1x16x128xbf16, #tpu.memory_space<vmem>>, %arg5: memref<1x128x256xbf16, #tpu.memory_space<vmem>>, %arg6: memref<1x128x1xf32, #tpu.memory_space<vmem>>, %arg7: memref<1x128x1xf32, #tpu.memory_space<vmem>>, %arg8: memref<1x16x1xf32, #tpu.memory_space<vmem>>, %arg9: memref<1x16x256xf32, #tpu.memory_space<vmem>>) attributes {dimension_semantics = [#tpu.dimension_semantics<parallel>, #tpu.dimension_semantics<parallel>, #tpu.dimension_semantics<parallel>, #tpu.dimension_semantics<arbitrary>], iteration_bounds = array<i64: 2, 1, 1, 1>, scalar_prefetch = 0 : i64, scratch_operands = 0 : i64, tpu.core_type = #tpu.core_type<tc>, window_params = [{transform_indices = @transform_0, window_bounds = array<i64: 1, 16, 128>}, {transform_indices = @transform_1, window_bounds = array<i64: 1, 128, 256>}, {transform_indices = @transform_2, window_bounds = array<i64: 1, 128, 1>}, {transform_indices = @transform_3, window_bounds = array<i64: 1, 128, 1>}, {transform_indices = @transform_4, window_bounds = array<i64: 1, 16, 1>}, {transform_indices = @transform_5, window_bounds = array<i64: 1, 16, 256>}]} {
    %c0 = arith.constant 0 : index
    %c0_0 = arith.constant 0 : index
    %c0_1 = arith.constant 0 : index
    %0 = vector.load %arg5[%c0, %c0_0, %c0_1] : memref<1x128x256xbf16, #tpu.memory_space<vmem>>, vector<1x128x256xbf16>
    %1 = vector.shape_cast %0 : vector<1x128x256xbf16> to vector<128x256xbf16>
    %2 = arith.extf %1 : vector<128x256xbf16> to vector<128x256xf32>
    %c0_2 = arith.constant 0 : index
    %c0_3 = arith.constant 0 : index
    %c0_4 = arith.constant 0 : index
    %3 = vector.load %arg6[%c0_2, %c0_3, %c0_4] : memref<1x128x1xf32, #tpu.memory_space<vmem>>, vector<1x128x1xf32>
    %4 = vector.shape_cast %3 : vector<1x128x1xf32> to vector<128x1xf32>
    %5 = vector.broadcast %4 : vector<128x1xf32> to vector<128x256xf32>
    %6 = arith.mulf %2, %5 : vector<128x256xf32>
    %c0_5 = arith.constant 0 : index
    %c0_6 = arith.constant 0 : index
    %c0_7 = arith.constant 0 : index
    %7 = vector.load %arg7[%c0_5, %c0_6, %c0_7] : memref<1x128x1xf32, #tpu.memory_space<vmem>>, vector<1x128x1xf32>
    %8 = vector.shape_cast %7 : vector<1x128x1xf32> to vector<128x1xf32>
    %9 = vector.broadcast %8 : vector<128x1xf32> to vector<128x256xf32>
    %10 = arith.addf %6, %9 : vector<128x256xf32>
    %cst = arith.constant 0.000000e+00 : f32
    %11 = vector.broadcast %cst : f32 to vector<128x256xf32>
    %12 = arith.maximumf %10, %11 : vector<128x256xf32>
    %13 = arith.truncf %12 : vector<128x256xf32> to vector<128x256xbf16>
    %c0_8 = arith.constant 0 : index
    %c0_9 = arith.constant 0 : index
    %c0_10 = arith.constant 0 : index
    %14 = vector.load %arg4[%c0_8, %c0_9, %c0_10] : memref<1x16x128xbf16, #tpu.memory_space<vmem>>, vector<1x16x128xbf16>
    %15 = vector.shape_cast %14 : vector<1x16x128xbf16> to vector<16x128xbf16>
    %cst_11 = arith.constant dense<0.000000e+00> : vector<16x256xf32>
    %16 = tpu.matmul %15, %13, %cst_11 {dimension_numbers = #tpu.dot_dimension_numbers<[1], [0], [0], [1], [0, 0, 1, 1], [], []>} : vector<16x128xbf16>, vector<128x256xbf16>, vector<16x256xf32> -> vector<16x256xf32>
    %c0_12 = arith.constant 0 : index
    %c0_13 = arith.constant 0 : index
    %c0_14 = arith.constant 0 : index
    %17 = vector.load %arg8[%c0_12, %c0_13, %c0_14] : memref<1x16x1xf32, #tpu.memory_space<vmem>>, vector<1x16x1xf32>
    %18 = vector.shape_cast %17 : vector<1x16x1xf32> to vector<16x1xf32>
    %19 = vector.broadcast %18 : vector<16x1xf32> to vector<16x256xf32>
    %20 = arith.addf %16, %19 : vector<16x256xf32>
    %cst_15 = arith.constant 0.000000e+00 : f32
    %21 = vector.broadcast %cst_15 : f32 to vector<16x256xf32>
    %22 = arith.maximumf %20, %21 : vector<16x256xf32>
    %c0_16 = arith.constant 0 : index
    %c0_17 = arith.constant 0 : index
    %c0_18 = arith.constant 0 : index
    %23 = vector.load %arg9[%c0_16, %c0_17, %c0_18] : memref<1x16x256xf32, #tpu.memory_space<vmem>>, vector<1x16x256xf32>
    %24 = vector.shape_cast %23 : vector<1x16x256xf32> to vector<16x256xf32>
    %25 = vector.shape_cast %22 : vector<16x256xf32> to vector<1x16x256xf32>
    tpu.vector_store %arg9[%c0_16, %c0_17, %c0_18], %25 {strides = array<i32>} : memref<1x16x256xf32, #tpu.memory_space<vmem>>, vector<1x16x256xf32>,
    return
  }
  func.func @transform_0(%arg0: i32, %arg1: i32, %arg2: i32, %arg3: i32) -> (i32, i32, i32) {
    %c0_i32 = arith.constant 0 : i32
    return %arg0, %arg1, %arg3 : i32, i32, i32
  }
  func.func @transform_1(%arg0: i32, %arg1: i32, %arg2: i32, %arg3: i32) -> (i32, i32, i32) {
    %c0_i32 = arith.constant 0 : i32
    return %arg0, %arg3, %arg2 : i32, i32, i32
  }
  func.func @transform_2(%arg0: i32, %arg1: i32, %arg2: i32, %arg3: i32) -> (i32, i32, i32) {
    %c0_i32 = arith.constant 0 : i32
    %c0_i32_0 = arith.constant 0 : i32
    return %arg0, %arg3, %c0_i32 : i32, i32, i32
  }
  func.func @transform_3(%arg0: i32, %arg1: i32, %arg2: i32, %arg3: i32) -> (i32, i32, i32) {
    %c0_i32 = arith.constant 0 : i32
    %c0_i32_0 = arith.constant 0 : i32
    return %arg0, %arg3, %c0_i32 : i32, i32, i32
  }
  func.func @transform_4(%arg0: i32, %arg1: i32, %arg2: i32, %arg3: i32) -> (i32, i32, i32) {
    %c0_i32 = arith.constant 0 : i32
    %c0_i32_0 = arith.constant 0 : i32
    return %arg0, %arg1, %c0_i32 : i32, i32, i32
  }
  func.func @transform_5(%arg0: i32, %arg1: i32, %arg2: i32, %arg3: i32) -> (i32, i32, i32) {
    %c0_i32 = arith.constant 0 : i32
    return %arg0, %arg1, %arg2 : i32, i32, i32
  }
}

</mosaic_0001>

<bundles_post_ra>
// kernel: matmul_t.1
= control target key start
LH: loop header
LB: loop body
LE: loop exit
PB: predicated region body
PF: predicated region fallthrough
CT: control target
= control target key end

     0   :  { %10 = vsyncpa [#allocation3], 0  ;;  %s1450_s0 = inlined_call_operand.vmem [shape: bf16[2,16,128], index: 0, kind: input, shape index: {}]   ;;  %s1451_s1 = inlined_call_operand.vmem [shape: bf16[2,128,256], index: 1, kind: input, shape index: {}]   ;;  %s1452_s2 = inlined_call_operand.vmem [shape: f32[2,128,1], index: 2, kind: input, shape index: {}]   ;;  %s1453_s3 = inlined_call_operand.vmem [shape: f32[2,128,1], index: 3, kind: input, shape index: {}]   ;;  %s1454_s4 = inlined_call_operand.vmem [shape: f32[2,16,1], index: 4, kind: input, shape index: {}]   ;;  %s1455_s5 = inlined_call_operand.hbm [shape: f32[2,16,256], index: 5, kind: output, shape index: {}]  }
   0x1   :  { %12 = vsyncpa [#allocation3 + $0x1], 0  ;;  %s1257_s18 = smov 0   ;;  %s1259_s19 = smov 0  }
   0x2   :  { %s1261_s20 = smov 0   ;;  %s1263_s21 = smov 0  }
   0x3   :  { %s1265_s22 = smov 0   ;;  %s1267_s23 = smov 0  }
   0x4 LB: > { %s1056_s24 = sadd.s32 4294967295, %s1221_s23   ;;  %s1057_s25 = sadd.s32 4294967294, %s1221_s23   ;;  %s1221_s23 = sphi %s1267_s23, %s18_s23   ;;  %s1217_s22 = sphi %s1265_s22, %s1462_s22   ;;  %s1213_s21 = sphi %s1263_s21, %s1461_s21   ;;  %s1209_s20 = sphi %s1261_s20, %s1460_s20   ;;  %s1205_s19 = sphi %s1259_s19, %s1459_s19   ;;  %s1201_s18 = sphi %s1257_s18, %s1458_s18  }
   0x5   : > { %s44_s26 = sadd.s32 1, %s1217_s22  ;;  %s199_s27 = sadd.s32 1, %s1209_s20 }
   0x6   : > { %p46_p0 = scmp.ge.s32.totalorder %s44_s26, 2  ;;  %p209_p1 = scmp.ne.s32.totalorder %s1209_s20, %s1205_s19 }
   0x7   : > { %p210_p2 = scmp.eq.s32.totalorder %s1056_s24, 1  ;;  %p215_p3 = scmp.ne.s32.totalorder %s1205_s19, %s1201_s18 }
   0x8   : > { %s1464_s26 = smov (%p46_p0, %s44_s26), 0  ;;  %p216_p5 = scmp.eq.s32.totalorder %s1057_s25, 1 }
   0x9   : > { %p1297_p4 = por %p210_p2, %p209_p1  ;;  %s192_s29 = ssub.s32 %s1217_s22, %s1464_s26 }
   0xa   : > { %p1060_p6 = scmp.ge.s32.totalorder %s1221_s23, 1  ;;  %p197_p7 = scmp.eq.s32.totalorder %s192_s29, 0 }
   0xb   : > { %p1304_p8 = por %p216_p5, %p215_p3  ;;  %p308_p9 = scmp.lt.s32.totalorder %s1221_s23, 3 }
   0xc   : > { %s1310_s6 = scalar_select %p197_p7, %s1209_s20, %s199_s27  }
   0xd   : > { %p309_p10 = pnand %p1060_p6, %p308_p9 }
   0xe   : > { %p385_p11 = scmp.lt.s32.totalorder (!%p309_p10), %s1213_s21, 1 }
   0xf   : > { %312 = sbr.rel (%p309_p10) target bundleno = 437 (0x1b5), region = 40 }
  0x14   : > { %v1223_v0 = vmov 0   ;;  %s1314_s7 = scalar_select %p385_p11, %s1213_s21, 1 }
  0x15   : > { %1143 = vset.pattern.permute.xlu1 %v1223_v0  ;;  %1142 = vset.pattern.permute.xlu0 %v1223_v0 }
  0x16   : > { %850 = vmatprep.mubr.bf16.mxu0 %v1223_v0  ;;  %s1317_s8 = sshll.u32 %s1314_s7, 7  ;;  %s1082_s15 = sshll.u32 %s1314_s7, 4 }
  0x17   : > { %s1323_s11 = scalar_lea.vmem %s1453_s3, %s1317_s8  ;;  %s1329_s14 = scalar_lea.vmem %s1452_s2, %s1317_s8 }
  0x18   : > { %v636_v1 = vld [vmem:[%s1323_s11 + $0x70] sm:$0xff]  ;;  %v637_v3 = vld [vmem:[%s1323_s11 + $0x78] sm:$0xff]  ;;  %v507_v5 = vld [vmem:[%s1329_s14 + $0x68] sm:$0xff]  ;;  %s441_s24 = scalar_lea.vmem %s1454_s4, %s1082_s15  ;;  %s1078_s25 = sshll.u32 %s1314_s7, 3 }
  0x19   : > { %v508_v2 = vld [vmem:[%s1329_s14 + $0x70] sm:$0xff]  ;;  %710 = vperm.xlu1 %1143, %v636_v1   ;;  %v509_v4 = vld [vmem:[%s1329_s14 + $0x78] sm:$0xff]  ;;  %v506_v6 = vld [vmem:[%s1329_s14 + $0x60] sm:$0xff]  ;;  %s1371_s9 = scalar_lea.vmem %s1450_s0, %s1078_s25  ;;  %s381_s7 = sand.u32 1, %s1205_s19  }
  0x1a   : > { %582 = vperm.xlu0 %1142, %v508_v2   ;;  %v635_v7 = vld [vmem:[%s1323_s11 + $0x68] sm:$0xff]  ;;  %v634_v8 = vld [vmem:[%s1323_s11 + $0x60] sm:$0xff]  ;;  %v505_v9 = vld [vmem:[%s1329_s14 + $0x58] sm:$0xff]  ;;  %s1083_s15 = sshll.u32 %s1213_s21, 9  ;;  %s1405_s25 = scalar_lea.sflag [#allocation3], %s381_s7 }
  0x1b   : > { %v504_v10 = vld [vmem:[%s1329_s14 + $0x50] sm:$0xff]  ;;  %v633_v11 = vld [vmem:[%s1323_s11 + $0x58] sm:$0xff]  ;;  %v503_v13 = vld [vmem:[%s1329_s14 + $0x48] sm:$0xff]  ;;  %s1224_s21 = smov [#allocation2]  }
  0x1c   : > { %v632_v12 = vld [vmem:[%s1323_s11 + $0x50] sm:$0xff]  ;;  %v502_v14 = vld [vmem:[%s1329_s14 + $0x40] sm:$0xff]  ;;  %v631_v15 = vld [vmem:[%s1323_s11 + $0x48] sm:$0xff]  ;;  %s1149_s29 = sshll.u32 %s1224_s21, 4  ;;  %s1150_s29 = int_to_ptr.vmem [resolvable:$false] %s1149_s29 }
  0x1d   : > { %715 = vperm.xlu1 %1143, %v637_v3   ;;  %v630_v16 = vld [vmem:[%s1323_s11 + $0x40] sm:$0xff]  ;;  %v501_v17 = vld [vmem:[%s1329_s14 + $0x38] sm:$0xff]  ;;  %v500_v18 = vld [vmem:[%s1329_s14 + $0x30] sm:$0xff] }
  0x1e   : > { %587 = vperm.xlu0 %1142, %v509_v4   ;;  %v629_v19 = vld [vmem:[%s1323_s11 + $0x38] sm:$0xff]  ;;  %v628_v20 = vld [vmem:[%s1323_s11 + $0x30] sm:$0xff]  ;;  %v499_v21 = vld [vmem:[%s1329_s14 + $0x28] sm:$0xff] }
  0x1f   : > { %v498_v22 = vld [vmem:[%s1329_s14 + $0x20] sm:$0xff]  ;;  %v627_v23 = vld [vmem:[%s1323_s11 + $0x28] sm:$0xff]  ;;  %v497_v25 = vld [vmem:[%s1329_s14 + $0x18] sm:$0xff] }
  0x20   : > { %v626_v24 = vld [vmem:[%s1323_s11 + $0x20] sm:$0xff]  ;;  %v496_v26 = vld [vmem:[%s1329_s14 + $0x10] sm:$0xff]  ;;  %v625_v27 = vld [vmem:[%s1323_s11 + $0x18] sm:$0xff] }
  0x21   : > { %577 = vperm.xlu1 %1143, %v507_v5   ;;  %v624_v28 = vld [vmem:[%s1323_s11 + $0x10] sm:$0xff]  ;;  %v495_v29 = vld [vmem:[%s1329_s14 + $0x8] sm:$0xff]  ;;  %v494_v30 = vld [vmem:[%s1329_s14] sm:$0xff] }
  0x22   : > { %572 = vperm.xlu0 %1142, %v506_v6   ;;  %v623_v31 = vld [vmem:[%s1323_s11 + $0x8] sm:$0xff]  ;;  %v622_v32 = vld [vmem:[%s1323_s11] sm:$0xff]  ;;  %s1377_s11 = scalar_lea.vmem %s1451_s1, %s1317_s8  ;;  %s1061_s8 = sshll.u32 %s381_s7, 5 }
  0x23   : > { %v801_v33 = vld [vmem:[%s441_s24 + $0x8] sm:$0xff]  ;;  %v800_v34 = vld [vmem:[%s441_s24] sm:$0xff]  ;;  %v460_v35 = vld [vmem:[%s1377_s11 + $0x70] sm:$0xff]  ;;  %s383_s13 = scalar_lea.vmem [#allocation2], %s1061_s8  ;;  %s1403_s24 = scalar_lea.hbm %s1455_s5, %s1083_s15 }
  0x24   : > { %v490_v36 = vunpack.c.l.bf16 %v460_v35  ;;  %v491_v37 = vunpack.c.h.bf16 %v460_v35  ;;  %v461_v38 = vld [vmem:[%s1377_s11 + $0x78] sm:$0xff]  ;;  %v459_v45 = vld [vmem:[%s1377_s11 + $0x68] sm:$0xff]  ;;  %v458_v48 = vld [vmem:[%s1377_s11 + $0x60] sm:$0xff]  ;;  %s888_s14 = sshll.u32 %s383_s13, 4  ;;  %s1398_s14 = int_to_ptr.vmem [resolvable:$true] %s888_s14 }
  0x25   : > { %705 = vperm.xlu1 %1143, %v635_v7   ;;  %v492_v41 = vunpack.c.l.bf16 %v461_v38  ;;  %v493_v42 = vunpack.c.h.bf16 %v461_v38  ;;  %v488_v52 = vunpack.c.l.bf16 %v459_v45  ;;  %v489_v53 = vunpack.c.h.bf16 %v459_v45  ;;  %v457_v5 = vld [vmem:[%s1377_s11 + $0x58] sm:$0xff]  ;;  %v456_v6 = vld [vmem:[%s1377_s11 + $0x50] sm:$0xff]  ;;  %s1145_s27 = scalar_lea.vmem %s1398_s14, 512  ;;  %p1152_p1 = scmp.lt.s32.totalorder %s1398_s14, %s1150_s29 }
  0x26   : > { %700 = vperm.xlu0 %1142, %v634_v8   ;;  %v486_v56 = vunpack.c.l.bf16 %v458_v48  ;;  %v487_v57 = vunpack.c.h.bf16 %v458_v48  ;;  %p1146_p12 = scmp.ne.s32.totalorder %s1398_s14, %s1145_s27 }
  0x28   : > { %p1147_p13 = pnand %p1146_p12, %p1297_p4 }
  0x29   : > { %567 = vperm.xlu1 %1143, %v505_v9  }
  0x2a   : > { %562 = vperm.xlu0 %1142, %v504_v10   ;;  %p1148_p0 = pneg %p1147_p13 }
  0x2d   : > { %695 = vperm.xlu1 %1143, %v633_v11  }
  0x2e   : > { %690 = vperm.xlu0 %1142, %v632_v12  }
  0x31   : > { %557 = vperm.xlu1 %1143, %v503_v13  }
  0x32   : > { %552 = vperm.xlu0 %1142, %v502_v14  }
  0x35   : > { %685 = vperm.xlu1 %1143, %v631_v15   ;;  %v484_v15 = vunpack.c.l.bf16 %v457_v5 }
  0x36   : > { %680 = vperm.xlu0 %1142, %v630_v16   ;;  %v485_v16 = vunpack.c.h.bf16 %v457_v5 }
  0x39   : > { %547 = vperm.xlu1 %1143, %v501_v17   ;;  %v482_v17 = vunpack.c.l.bf16 %v456_v6 }
  0x3a   : > { %542 = vperm.xlu0 %1142, %v500_v18   ;;  %v483_v18 = vunpack.c.h.bf16 %v456_v6 }
  0x3d   : > { %675 = vperm.xlu1 %1143, %v629_v19  }
  0x3e   : > { %670 = vperm.xlu0 %1142, %v628_v20  }
  0x41   : > { %537 = vperm.xlu1 %1143, %v499_v21  }
  0x42   : > { %532 = vperm.xlu0 %1142, %v498_v22  }
  0x45   : > { %665 = vperm.xlu1 %1143, %v627_v23  }
  0x46   : > { %660 = vperm.xlu0 %1142, %v626_v24  }
  0x49   : > { %527 = vperm.xlu1 %1143, %v497_v25  }
  0x4a   : > { %522 = vperm.xlu0 %1142, %v496_v26  }
  0x4d   : > { %655 = vperm.xlu1 %1143, %v625_v27  }
  0x4e   : > { %650 = vperm.xlu0 %1142, %v624_v28  }
  0x51   : > { %517 = vperm.xlu1 %1143, %v495_v29  }
  0x52   : > { %512 = vperm.xlu0 %1142, %v494_v30  }
  0x55   : > { %645 = vperm.xlu1 %1143, %v623_v31   ;;  %v455_v31 = vld [vmem:[%s1377_s11 + $0x48] sm:$0xff] }
  0x56   : > { %640 = vperm.xlu0 %1142, %v622_v32   ;;  %v454_v32 = vld [vmem:[%s1377_s11 + $0x40] sm:$0xff] }
  0x59   : > { %809 = vperm.xlu1 %1143, %v801_v33  }
  0x5a   : > { %804 = vperm.xlu0 %1142, %v800_v34  }
  0x94   : > { %v711_v39 = vpop.permute.xlu1 %710 }
  0x95   : > { %v583_v40 = vpop.permute.xlu0 %582 }
  0x96   : > { %v618_v43 = vmul.f32 %v583_v40, %v490_v36  ;;  %v619_v44 = vmul.f32 %v583_v40, %v491_v37  ;;  %v481_v40 = vunpack.c.h.bf16 %v455_v31 }
  0x98   : > { %v716_v46 = vpop.permute.xlu1 %715  ;;  %v746_v51 = vadd.f32 %v711_v39, %v618_v43  ;;  %v747_v54 = vadd.f32 %v711_v39, %v619_v44  ;;  %v480_v39 = vunpack.c.l.bf16 %v455_v31 }
  0x99   : > { %v588_v47 = vpop.permute.xlu0 %587 }
  0x9a   : > { %v620_v49 = vmul.f32 %v588_v47, %v492_v41  ;;  %v621_v50 = vmul.f32 %v588_v47, %v493_v42  ;;  %v779_v61 = vmax.f32 %v747_v54, 0.0  ;;  %v778_v63 = vmax.f32 %v746_v51, 0.0 }
  0x9b   : > { %v478_v41 = vunpack.c.l.bf16 %v454_v32  ;;  %v479_v42 = vunpack.c.h.bf16 %v454_v32 }
  0x9c   : > { %v748_v55 = vadd.f32 %v716_v46, %v620_v49  ;;  %v749_v58 = vadd.f32 %v716_v46, %v621_v50  ;;  %v578_v59 = vpop.permute.xlu1 %577 }
  0x9d   : > { %v573_v60 = vpop.permute.xlu0 %572  ;;  %v616_v1 = vmul.f32 %v578_v59, %v488_v52  ;;  %v617_v2 = vmul.f32 %v578_v59, %v489_v53 }
  0x9e   : > { %v781_v62 = vmax.f32 %v749_v58, 0.0  ;;  %v780_v0 = vmax.f32 %v748_v55, 0.0  ;;  %v614_v3 = vmul.f32 %v573_v60, %v486_v56  ;;  %v615_v4 = vmul.f32 %v573_v60, %v487_v57  ;;  %v453_v55 = vld [vmem:[%s1377_s11 + $0x38] sm:$0xff]  ;;  %v452_v56 = vld [vmem:[%s1377_s11 + $0x30] sm:$0xff] }
  0xa0   : > { %v706_v7 = vpop.permute.xlu1 %705  ;;  %v797_v9 = vpack.c.bf16 %v781_v62, %v779_v61  ;;  %v796_v10 = vpack.c.bf16 %v780_v0, %v778_v63  ;;  %v476_v63 = vunpack.c.l.bf16 %v453_v55  ;;  %v477_v0 = vunpack.c.h.bf16 %v453_v55 }
  0xa1   : > { %v701_v8 = vpop.permute.xlu0 %700  ;;  %v744_v11 = vadd.f32 %v706_v7, %v616_v1  ;;  %v745_v12 = vadd.f32 %v706_v7, %v617_v2  ;;  %v474_v1 = vunpack.c.l.bf16 %v452_v56  ;;  %v475_v2 = vunpack.c.h.bf16 %v452_v56 }
  0xa2   : > { %v742_v13 = vadd.f32 %v701_v8, %v614_v3  ;;  %v743_v14 = vadd.f32 %v701_v8, %v615_v4  ;;  %818 = vmatprep.subr.bf16.mxu0 %v797_v9 }
  0xa3   : > { %v776_v19 = vmax.f32 %v744_v11, 0.0  ;;  %v777_v20 = vmax.f32 %v745_v12, 0.0  ;;  %819 = vmatpush1.bf16.msra.mxu0 %v796_v10 }
  0xa4   : > { %v774_v21 = vmax.f32 %v742_v13, 0.0  ;;  %v775_v22 = vmax.f32 %v743_v14, 0.0  ;;  %v568_v23 = vpop.permute.xlu1 %567 }
  0xa5   : > { %v563_v24 = vpop.permute.xlu0 %562  ;;  %v612_v27 = vmul.f32 %v568_v23, %v484_v15  ;;  %v613_v28 = vmul.f32 %v568_v23, %v485_v16  ;;  %v451_v15 = vld [vmem:[%s1377_s11 + $0x28] sm:$0xff]  ;;  %v450_v16 = vld [vmem:[%s1377_s11 + $0x20] sm:$0xff] }
  0xa6   : > { %v795_v25 = vpack.c.bf16 %v777_v20, %v775_v22  ;;  %v794_v26 = vpack.c.bf16 %v776_v19, %v774_v21  ;;  %v610_v29 = vmul.f32 %v563_v24, %v482_v17  ;;  %v611_v30 = vmul.f32 %v563_v24, %v483_v18 }
  0xa7   : > { %v472_v23 = vunpack.c.l.bf16 %v451_v15  ;;  %v473_v24 = vunpack.c.h.bf16 %v451_v15 }
  0xa8   : > { %820 = vmatprep.subr.bf16.mxu0 %v795_v25  ;;  %v696_v33 = vpop.permute.xlu1 %695  ;;  %v470_v25 = vunpack.c.l.bf16 %v450_v16 }
  0xa9   : > { %v691_v34 = vpop.permute.xlu0 %690  ;;  %v740_v35 = vadd.f32 %v696_v33, %v612_v27  ;;  %v741_v36 = vadd.f32 %v696_v33, %v613_v28  ;;  %821 = vmatpush1.bf16.msra.mxu0 %v794_v26  ;;  %v471_v26 = vunpack.c.h.bf16 %v450_v16 }
  0xaa   : > { %v738_v37 = vadd.f32 %v691_v34, %v610_v29  ;;  %v739_v38 = vadd.f32 %v691_v34, %v611_v30 }
  0xab   : > { %v772_v43 = vmax.f32 %v740_v35, 0.0  ;;  %v773_v44 = vmax.f32 %v741_v36, 0.0 }
  0xac   : > { %v770_v45 = vmax.f32 %v738_v37, 0.0  ;;  %v771_v46 = vmax.f32 %v739_v38, 0.0  ;;  %v558_v47 = vpop.permute.xlu1 %557 }
  0xad   : > { %v553_v48 = vpop.permute.xlu0 %552  ;;  %v608_v51 = vmul.f32 %v558_v47, %v480_v39  ;;  %v609_v52 = vmul.f32 %v558_v47, %v481_v40  ;;  %v449_v39 = vld [vmem:[%s1377_s11 + $0x18] sm:$0xff]  ;;  %v448_v40 = vld [vmem:[%s1377_s11 + $0x10] sm:$0xff] }
  0xae   : > { %v793_v49 = vpack.c.bf16 %v773_v44, %v771_v46  ;;  %v792_v50 = vpack.c.bf16 %v772_v43, %v770_v45  ;;  %v606_v53 = vmul.f32 %v553_v48, %v478_v41  ;;  %v607_v54 = vmul.f32 %v553_v48, %v479_v42 }
  0xaf   : > { %v468_v47 = vunpack.c.l.bf16 %v449_v39  ;;  %v469_v48 = vunpack.c.h.bf16 %v449_v39 }
  0xb0   : > { %822 = vmatprep.subr.bf16.mxu0 %v793_v49  ;;  %v686_v57 = vpop.permute.xlu1 %685  ;;  %v466_v49 = vunpack.c.l.bf16 %v448_v40 }
  0xb1   : > { %v681_v58 = vpop.permute.xlu0 %680  ;;  %v736_v59 = vadd.f32 %v686_v57, %v608_v51  ;;  %v737_v60 = vadd.f32 %v686_v57, %v609_v52  ;;  %823 = vmatpush1.bf16.msra.mxu0 %v792_v50  ;;  %v467_v50 = vunpack.c.h.bf16 %v448_v40 }
  0xb2   : > { %v734_v61 = vadd.f32 %v681_v58, %v606_v53  ;;  %v735_v62 = vadd.f32 %v681_v58, %v607_v54 }
  0xb3   : > { %v768_v3 = vmax.f32 %v736_v59, 0.0  ;;  %v769_v4 = vmax.f32 %v737_v60, 0.0 }
  0xb4   : > { %v766_v5 = vmax.f32 %v734_v61, 0.0  ;;  %v767_v6 = vmax.f32 %v735_v62, 0.0  ;;  %v548_v7 = vpop.permute.xlu1 %547 }
  0xb5   : > { %v543_v8 = vpop.permute.xlu0 %542  ;;  %v604_v11 = vmul.f32 %v548_v7, %v476_v63  ;;  %v605_v12 = vmul.f32 %v548_v7, %v477_v0  ;;  %v447_v63 = vld [vmem:[%s1377_s11 + $0x8] sm:$0xff]  ;;  %v446_v0 = vld [vmem:[%s1377_s11] sm:$0xff] }
  0xb6   : > { %v791_v9 = vpack.c.bf16 %v769_v4, %v767_v6  ;;  %v790_v10 = vpack.c.bf16 %v768_v3, %v766_v5  ;;  %v602_v13 = vmul.f32 %v543_v8, %v474_v1  ;;  %v603_v14 = vmul.f32 %v543_v8, %v475_v2 }
  0xb7   : > { %v464_v7 = vunpack.c.l.bf16 %v447_v63  ;;  %v465_v8 = vunpack.c.h.bf16 %v447_v63 }
  0xb8   : > { %824 = vmatprep.subr.bf16.mxu0 %v791_v9  ;;  %v676_v17 = vpop.permute.xlu1 %675  ;;  %v462_v9 = vunpack.c.l.bf16 %v446_v0 }
  0xb9   : > { %v671_v18 = vpop.permute.xlu0 %670  ;;  %v732_v19 = vadd.f32 %v676_v17, %v604_v11  ;;  %v733_v20 = vadd.f32 %v676_v17, %v605_v12  ;;  %825 = vmatpush1.bf16.msra.mxu0 %v790_v10  ;;  %v463_v10 = vunpack.c.h.bf16 %v446_v0 }
  0xba   : > { %v730_v21 = vadd.f32 %v671_v18, %v602_v13  ;;  %v731_v22 = vadd.f32 %v671_v18, %v603_v14 }
  0xbb   : > { %v764_v27 = vmax.f32 %v732_v19, 0.0  ;;  %v765_v28 = vmax.f32 %v733_v20, 0.0 }
  0xbc   : > { %v762_v29 = vmax.f32 %v730_v21, 0.0  ;;  %v763_v30 = vmax.f32 %v731_v22, 0.0  ;;  %v538_v31 = vpop.permute.xlu1 %537 }
  0xbd   : > { %v533_v32 = vpop.permute.xlu0 %532  ;;  %v600_v35 = vmul.f32 %v538_v31, %v472_v23  ;;  %v601_v36 = vmul.f32 %v538_v31, %v473_v24 }
  0xbe   : > { %v789_v33 = vpack.c.bf16 %v765_v28, %v763_v30  ;;  %v788_v34 = vpack.c.bf16 %v764_v27, %v762_v29  ;;  %v598_v37 = vmul.f32 %v533_v32, %v470_v25  ;;  %v599_v38 = vmul.f32 %v533_v32, %v471_v26 }
  0xc0   : > { %826 = vmatprep.subr.bf16.mxu0 %v789_v33  ;;  %v666_v41 = vpop.permute.xlu1 %665 }
  0xc1   : > { %v661_v42 = vpop.permute.xlu0 %660  ;;  %v728_v43 = vadd.f32 %v666_v41, %v600_v35  ;;  %v729_v44 = vadd.f32 %v666_v41, %v601_v36  ;;  %827 = vmatpush1.bf16.msra.mxu0 %v788_v34  ;;  %v1144_v35 = vld [vmem:[%s1371_s9] sm:$0xff]   ;;  %s1151_s9 = scalar_lea.vmem %s1150_s29, 1024 }
  0xc2   : > { %v726_v45 = vadd.f32 %v661_v42, %v598_v37  ;;  %v727_v46 = vadd.f32 %v661_v42, %v599_v38  ;;  %p1153_p2 = scmp.lt.s32.totalorder %s1151_s9, %s1145_s27 }
  0xc3   : > { %v760_v51 = vmax.f32 %v728_v43, 0.0  ;;  %v761_v52 = vmax.f32 %v729_v44, 0.0 }
  0xc4   : > { %v758_v53 = vmax.f32 %v726_v45, 0.0  ;;  %v759_v54 = vmax.f32 %v727_v46, 0.0  ;;  %v528_v55 = vpop.permute.xlu1 %527  ;;  %p1154_p3 = por %p1153_p2, %p1152_p1 }
  0xc5   : > { %v523_v56 = vpop.permute.xlu0 %522  ;;  %v596_v59 = vmul.f32 %v528_v55, %v468_v47  ;;  %v597_v60 = vmul.f32 %v528_v55, %v469_v48 }
  0xc6   : > { %v787_v57 = vpack.c.bf16 %v761_v52, %v759_v54  ;;  %v786_v58 = vpack.c.bf16 %v760_v51, %v758_v53  ;;  %v594_v61 = vmul.f32 %v523_v56, %v466_v49  ;;  %v595_v62 = vmul.f32 %v523_v56, %v467_v50  ;;  %p1155_p5 = pnand %p1154_p3, %p1148_p0 }
  0xc8   : > { %828 = vmatprep.subr.bf16.mxu0 %v787_v57  ;;  %v656_v1 = vpop.permute.xlu1 %655 }
  0xc9   : > { %v651_v2 = vpop.permute.xlu0 %650  ;;  %v724_v3 = vadd.f32 %v656_v1, %v596_v59  ;;  %v725_v4 = vadd.f32 %v656_v1, %v597_v60  ;;  %829 = vmatpush1.bf16.msra.mxu0 %v786_v58 }
  0xca   : > { %v722_v5 = vadd.f32 %v651_v2, %v594_v61  ;;  %v723_v6 = vadd.f32 %v651_v2, %v595_v62 }
  0xcb   : > { %v756_v11 = vmax.f32 %v724_v3, 0.0  ;;  %v757_v12 = vmax.f32 %v725_v4, 0.0 }
  0xcc   : > { %v754_v13 = vmax.f32 %v722_v5, 0.0  ;;  %v755_v14 = vmax.f32 %v723_v6, 0.0  ;;  %v518_v15 = vpop.permute.xlu1 %517 }
  0xcd   : > { %v513_v16 = vpop.permute.xlu0 %512  ;;  %v592_v19 = vmul.f32 %v518_v15, %v464_v7  ;;  %v593_v20 = vmul.f32 %v518_v15, %v465_v8 }
  0xce   : > { %v785_v17 = vpack.c.bf16 %v757_v12, %v755_v14  ;;  %v784_v18 = vpack.c.bf16 %v756_v11, %v754_v13  ;;  %v590_v21 = vmul.f32 %v513_v16, %v462_v9  ;;  %v591_v22 = vmul.f32 %v513_v16, %v463_v10 }
  0xd0   : > { %830 = vmatprep.subr.bf16.mxu0 %v785_v17  ;;  %v646_v23 = vpop.permute.xlu1 %645 }
  0xd1   : > { %v641_v24 = vpop.permute.xlu0 %640  ;;  %v720_v25 = vadd.f32 %v646_v23, %v592_v19  ;;  %v721_v26 = vadd.f32 %v646_v23, %v593_v20  ;;  %831 = vmatpush1.bf16.msra.mxu0 %v784_v18 }
  0xd2   : > { %v718_v27 = vadd.f32 %v641_v24, %v590_v21  ;;  %v719_v28 = vadd.f32 %v641_v24, %v591_v22 }
  0xd3   : > { %v752_v29 = vmax.f32 %v720_v25, 0.0  ;;  %v753_v30 = vmax.f32 %v721_v26, 0.0 }
  0xd4   : > { %v750_v31 = vmax.f32 %v718_v27, 0.0  ;;  %v751_v32 = vmax.f32 %v719_v28, 0.0  ;;  %v810_v42 = vpop.permute.xlu1 %809 }
  0xd5   : > { %v805_v36 = vpop.permute.xlu0 %804 }
  0xd6   : > { %v783_v33 = vpack.c.bf16 %v753_v30, %v751_v32  ;;  %v782_v34 = vpack.c.bf16 %v752_v29, %v750_v31 }
  0xd8   : > { %832 = vmatprep.subr.bf16.mxu0 %v783_v33 }
  0xd9   : > { %833 = vmatpush1.bf16.msra.mxu0 %v782_v34 }
  0xdc   : > { %851 = vmatmul.mubr.bf16.vlgmr.msra.gmra.mxu0 %v1144_v35 }
 0x19c   : > { %v852_v37 = vpop.f32.mrf.mxu0 }
 0x19d   : > { %v853_v38 = vadd.f32 %v852_v37, %v805_v36 }
 0x19e   : > { %v854_v39 = vpop.f32.mrf.mxu0 }
 0x19f   : > { %v861_v40 = vmax.f32 %v853_v38, 0.0  ;;  %v855_v41 = vadd.f32 %v854_v39, %v805_v36 }
 0x1a0   : > { %v856_v43 = vpop.f32.mrf.mxu0 }
 0x1a1   : > { %865 = vst [vmem:[%s383_s13] sm:$0xff] %v861_v40  ;;  %v862_v44 = vmax.f32 %v855_v41, 0.0  ;;  %v857_v45 = vadd.f32 %v856_v43, %v810_v42 }
 0x1a2   : > { %v858_v46 = vpop.f32.mrf.mxu0 }
 0x1a3   : > { %866 = vst [vmem:[%s383_s13 + $0x8] sm:$0xff] %v862_v44  ;;  %v863_v47 = vmax.f32 %v857_v45, 0.0  ;;  %v859_v48 = vadd.f32 %v858_v46, %v810_v42 }
 0x1a5   : > { %867 = vst [vmem:[%s383_s13 + $0x10] sm:$0xff] %v863_v47  ;;  %v864_v49 = vmax.f32 %v859_v48, 0.0 }
 0x1a7   : > { %868 = vst [vmem:[%s383_s13 + $0x18] sm:$0xff] %v864_v49 }
 0x1a8   : > { %1158 = shalt.err (!%p1155_p5)
}
 0x1a9   : > { %s1159_s10 = scalar_lea.hbm %s1403_s24, 512  ;;  %s1163_s7 = scalar_lea.hbm %s1455_s5, 1024 }
 0x1aa   : > { %p1160_p6 = scmp.ne.s32.totalorder %s1403_s24, %s1159_s10  ;;  %p1164_p10 = scmp.lt.s32.totalorder %s1403_s24, %s1455_s5 }
 0x1ab   : > { %p1165_p11 = scmp.lt.s32.totalorder %s1163_s7, %s1159_s10 }
 0x1ac   : > { %p1161_p7 = pnand %p1160_p6, %p1297_p4 }
 0x1ad   : > { %p1166_p12 = por %p1165_p11, %p1164_p10 }
 0x1ae   : > { %p1162_p9 = pneg %p1161_p7 }
 0x1b0   : > { %p1167_p13 = pnand %p1166_p12, %p1162_p9 }
 0x1b2   : > { %1170 = shalt.err (!%p1167_p13)
}
 0x1b3   : > { %s1225_s15 = smov 256   ;;  %s1226_s16 = smov 16  }
 0x1b4   : > { %1084 = dma.vmem_to_hbm [thread:$0]  (%p1297_p4), %s1398_s14, 512, %s1403_s24, %s1405_s25, %s1225_s15, %s1225_s15, %s1226_s16  }
 0x1b5 PF: > { %p1090_p0 = scmp.ge.s32.totalorder %s1221_s23, 2  ;;  %s903_s17 = sand.u32 1, %s1201_s18  }
 0x1b6   : > { %s904_s27 = scalar_lea.sflag [#allocation3], %s903_s17 }
 0x1b7   : > { %p1087_p1 = pnand %p1090_p0, %p1304_p8 }
 0x1b9   : > { %p1088_p2 = pneg %p1087_p1 }
 0x1bb   : > { %1196 = dma.done.wait (%p1088_p2), %s904_s27, 512  }
 0x1bc   : > { %1198 = vsyncadd (%p1088_p2), %s904_s27, 4294966784  ;;  %s18_s23 = sadd.s32 1, %s1221_s23   ;;  %s1458_s18 = smov %s1205_s19 }
 0x1bd   : > { %p15_p3 = scmp.ge.s32.totalorder %s18_s23, 4   ;;  %s1459_s19 = smov %s1209_s20 }
 0x1be   : > { %s1460_s20 = smov %s1310_s6  ;;  %s1461_s21 = smov %s1217_s22 }
 0x1bf   : > { %s1462_s22 = smov %s1464_s26  ;;  %17 = sbr.rel (!%p15_p3) target bundleno = 4 (0x4), region = 87 }
 0x1c4   :  { %909 = vsyncpa [#allocation3], 1 }
 0x1c5   :  { %911 = vsyncpa [#allocation3 + $0x1], 1 }

</bundles_post_ra>
